<compile_context>
chip_gen: v7x
topology: tpu7x:2x2x1
jax: 0.10.0
libtpu: 0.0.40
codegen_flags: <defaults>
</compile_context>

<pallas_src>
import functools

import jax
import jax.numpy as jnp
from jax.experimental import pallas as pl
from jax.experimental.pallas import tpu as pltpu


# ----------------------------------------------------------------------------
# Kernel 1: fused feature kernel (pools + depthwise conv + 1x1 conv + BN partial
# statistics), one or more batch elements per grid step.
#
#   xs_ref   : (nb, 4C, Ho+1, Wo+1)  parity-decomposed, zero-padded input
#              xs[(2*ri+rj)*C + c, a, b] = xpad[c, 2a+ri, 2b+rj]
#   wsh_ref  : (4, COUT, 4C)         dw-conv taps folded into the pw conv,
#                                    grouped by window shift (qi, qj)
#   wmx_ref  : (COUT, C)             pw weights of the maxpool branch
#   wmn_ref  : (COUT, C)             pw weights of the minpool branch
#   feat_ref : (nb, COUT, Ho*Wo)     pre-BN features (lane-dense last dim)
#   stats_ref: (1, COUT, 2)          per-grid-step partial [sum, sum-of-squares]
# ----------------------------------------------------------------------------
def fct_feature_kernel(xs_ref, wsh_ref, wmx_ref, wmn_ref, feat_ref, stats_ref,
                       *, nb, cin, ho, wo, cout):
    C = cin
    P = ho * wo
    s1 = jnp.zeros((cout, 1), jnp.float32)
    s2 = jnp.zeros((cout, 1), jnp.float32)

    for b in range(nb):
        # Four shifted windows of the parity slabs.  Shift offsets are only 0/1
        # in each dim, so these are plain contiguous window loads (no stride-2
        # slicing).  Flatten so Ho*Wo sits on the lane axis.
        slabs = []
        for qi in (0, 1):
            for qj in (0, 1):
                win = xs_ref[b, :, qi:qi + ho, qj:qj + wo]          # (4C, Ho, Wo)
                slabs.append(win.reshape(4 * C, P))                 # (4C, Ho*Wo)
        s00, s01, s10, s11 = slabs

        # 2x2 max / min pool taps == centre 2x2 of the 4x4 dw receptive field.
        t00 = s00[3 * C:4 * C, :]     # x[2i+0, 2j+0]
        t01 = s01[2 * C:3 * C, :]     # x[2i+0, 2j+1]
        t10 = s10[1 * C:2 * C, :]     # x[2i+1, 2j+0]
        t11 = s11[0 * C:1 * C, :]     # x[2i+1, 2j+1]
        mx = jnp.maximum(jnp.maximum(t00, t01), jnp.maximum(t10, t11))
        mn = jnp.minimum(jnp.minimum(t00, t01), jnp.minimum(t10, t11))

        # Fused 1x1 conv, all branches accumulated into one f32 accumulator.
        # The depthwise conv rides the MXU via the 4 per-shift folded weights.
        acc = jnp.dot(wmx_ref[...], mx, preferred_element_type=jnp.float32)
        acc = acc + jnp.dot(wmn_ref[...], mn, preferred_element_type=jnp.float32)
        for s_idx in range(4):
            acc = acc + jnp.dot(wsh_ref[s_idx], slabs[s_idx],
                                preferred_element_type=jnp.float32)

        feat_ref[b] = acc                                           # (COUT, Ho*Wo)
        s1 = s1 + jnp.sum(acc, axis=1, keepdims=True)
        s2 = s2 + jnp.sum(acc * acc, axis=1, keepdims=True)

    stats_ref[0, :, 0:1] = s1
    stats_ref[0, :, 1:2] = s2


# ----------------------------------------------------------------------------
# Kernel 2: grid-tiled BatchNorm apply (training-mode forward, batch statistics
# reconstructed from the per-step partial sums emitted by kernel 1).
# ----------------------------------------------------------------------------
def fct_bn_kernel(feat_ref, stats_ref, gamma_ref, beta_ref, o_ref, *, count, eps):
    totals = jnp.sum(stats_ref[...], axis=0)              # (COUT, 2)
    inv_n = 1.0 / count
    mean = totals[:, 0:1] * inv_n                          # (COUT, 1)
    var = totals[:, 1:2] * inv_n - mean * mean             # biased batch variance
    scale = gamma_ref[...] * jax.lax.rsqrt(var + eps)      # (COUT, 1)
    shift = beta_ref[...] - mean * scale
    o_ref[...] = feat_ref[...] * scale + shift             # broadcast along lanes
    # TODO(synk): running_mean / running_var updates (a training side effect of
    # nn.BatchNorm2d) are not modeled; only the forward output is reproduced.


# ----------------------------------------------------------------------------
# Wrapper: layout plumbing (pad + space-to-depth, weight folding), pallas calls.
# ----------------------------------------------------------------------------
def _pick_batch_block(n, per_elem_bytes):
    """Batch elements per grid step: keep >=2 grid steps (v7x has 2 TensorCores)
    and grow blocks only while they stay comfortably inside VMEM."""
    nb = 1
    while (n % (nb * 2) == 0 and n // (nb * 2) >= 2 and nb < 8
           and (nb * 2) * per_elem_bytes <= (4 << 20)):
        nb *= 2
    return nb


def fct_forward(x_nchw, w_dw, w_pw, gamma, beta, eps=1e-5):
    """x_nchw: (N, C, H, W);  w_dw: (C, 1, 4, 4);  w_pw: (COUT, 3C, 1, 1)."""
    N, C, H, W = x_nchw.shape
    COUT = w_pw.shape[0]
    assert H % 2 == 0 and W % 2 == 0, "even H, W assumed"
    Ho, Wo = H // 2, W // 2
    P = Ho * Wo

    x = x_nchw.astype(jnp.float32)
    # TODO(synk): on v6e/v7x the activations could be stored as bf16 to halve
    # input DMA bytes; kept f32 here to match the f32 reference numerics.

    # ---- pad(1) + space-to-depth: xs[n, (2ri+rj)*C + c, a, b] = xpad[n,c,2a+ri,2b+rj]
    xpad = jnp.pad(x, ((0, 0), (0, 0), (1, 1), (1, 1)))
    xs = xpad.reshape(N, C, Ho + 1, 2, Wo + 1, 2)
    xs = jnp.transpose(xs, (0, 3, 5, 1, 2, 4))              # (N, ri, rj, C, Ho+1, Wo+1)
    xs = xs.reshape(N, 4 * C, Ho + 1, Wo + 1)

    # ---- weight folding --------------------------------------------------------
    wpw2 = w_pw[:, :, 0, 0].astype(jnp.float32)             # (COUT, 3C): [max|min|dw]
    wmx = wpw2[:, 0:C]
    wmn = wpw2[:, C:2 * C]
    wdwb = wpw2[:, 2 * C:3 * C]                             # pw weights of dw branch
    wdw4 = w_dw[:, 0, :, :].astype(jnp.float32)             # (C, 4, 4)
    wk = wdw4.reshape(C, 2, 2, 2, 2)                        # [c, qi, ri, qj, rj]
    wk = jnp.transpose(wk, (1, 3, 2, 4, 0))                 # [qi, qj, ri, rj, c]
    wsh = wk[:, :, :, :, None, :] * wdwb[None, None, None, None, :, :]
    wsh = jnp.transpose(wsh, (0, 1, 4, 2, 3, 5))            # [qi, qj, o, ri, rj, c]
    wsh = wsh.reshape(4, COUT, 4 * C)                       # per-shift folded weights

    per_elem_bytes = (4 * C * (Ho + 1) * (Wo + 1) + COUT * P) * 4
    nb = _pick_batch_block(N, per_elem_bytes)
    G = N // nb

    # TODO(synk): for large H*W, add row-strip tiling (1-row halo) of Ho so the
    # per-step block fits v7x's 64 MiB VMEM; at these sizes whole images fit.
    vmem_limit = 32 * 1024 * 1024

    feat, stats = pl.pallas_call(
        functools.partial(fct_feature_kernel,
                          nb=nb, cin=C, ho=Ho, wo=Wo, cout=COUT),
        out_shape=(jax.ShapeDtypeStruct((N, COUT, P), jnp.float32),
                   jax.ShapeDtypeStruct((G, COUT, 2), jnp.float32)),
        grid=(G,),
        in_specs=[
            pl.BlockSpec((nb, 4 * C, Ho + 1, Wo + 1), lambda g: (g, 0, 0, 0)),
            pl.BlockSpec((4, COUT, 4 * C), lambda g: (0, 0, 0)),
            pl.BlockSpec((COUT, C), lambda g: (0, 0)),
            pl.BlockSpec((COUT, C), lambda g: (0, 0)),
        ],
        out_specs=(
            pl.BlockSpec((nb, COUT, P), lambda g: (g, 0, 0)),
            pl.BlockSpec((1, COUT, 2), lambda g: (g, 0, 0)),
        ),
        compiler_params=pltpu.CompilerParams(
            dimension_semantics=("parallel",),
            vmem_limit_bytes=vmem_limit),
        cost_estimate=pl.CostEstimate(
            flops=int(2 * N * P * COUT * 18 * C),
            transcendentals=0,
            bytes_accessed=int(4 * (xs.size + N * COUT * P + G * COUT * 2
                                    + wsh.size + wmx.size + wmn.size))),
    )(xs, wsh, wmx, wmn)

    out2 = pl.pallas_call(
        functools.partial(fct_bn_kernel, count=float(N * P), eps=float(eps)),
        out_shape=jax.ShapeDtypeStruct((N, COUT, P), jnp.float32),
        grid=(G,),
        in_specs=[
            pl.BlockSpec((nb, COUT, P), lambda g: (g, 0, 0)),
            pl.BlockSpec((G, COUT, 2), lambda g: (0, 0, 0)),
            pl.BlockSpec((COUT, 1), lambda g: (0, 0)),
            pl.BlockSpec((COUT, 1), lambda g: (0, 0)),
        ],
        out_specs=pl.BlockSpec((nb, COUT, P), lambda g: (g, 0, 0)),
        compiler_params=pltpu.CompilerParams(
            dimension_semantics=("parallel",),
            vmem_limit_bytes=vmem_limit),
        cost_estimate=pl.CostEstimate(
            flops=int(2 * N * P * COUT + 8 * COUT),
            transcendentals=int(COUT),
            bytes_accessed=int(4 * (2 * N * COUT * P + G * COUT * 2 + 2 * COUT))),
    )(feat, stats,
      gamma.reshape(COUT, 1).astype(jnp.float32),
      beta.reshape(COUT, 1).astype(jnp.float32))

    # (N, COUT, Ho*Wo) is already channel-major: reshape straight to NCHW.
    return out2.reshape(N, COUT, Ho, Wo)


# ----------------------------------------------------------------------------
# Pure-JAX reference (in-script numerical sanity check)
# ----------------------------------------------------------------------------
def fct_reference(x, w_dw, w_pw, gamma, beta, eps=1e-5):
    N, C, H, W = x.shape
    z = jax.lax.conv_general_dilated(
        x, w_dw, window_strides=(2, 2), padding=((1, 1), (1, 1)),
        feature_group_count=C, dimension_numbers=("NCHW", "OIHW", "NCHW"))
    mx = jax.lax.reduce_window(x, -jnp.inf, jax.lax.max,
                               (1, 1, 2, 2), (1, 1, 2, 2), "VALID")
    mn = -jax.lax.reduce_window(-x, -jnp.inf, jax.lax.max,
                                (1, 1, 2, 2), (1, 1, 2, 2), "VALID")
    cat = jnp.concatenate([mx, mn, z], axis=1)
    y = jnp.einsum("ncij,oc->noij", cat, w_pw[:, :, 0, 0])
    mean = y.mean(axis=(0, 2, 3), keepdims=True)
    var = ((y - mean) ** 2).mean(axis=(0, 2, 3), keepdims=True)
    return ((y - mean) * jax.lax.rsqrt(var + eps)
            * gamma[None, :, None, None] + beta[None, :, None, None])


if __name__ == "__main__":
    N, CIN, COUT, H, W = 2, 4, 8, 16, 16

    key = jax.random.PRNGKey(0)
    k1, k2, k3, k4, k5 = jax.random.split(key, 5)
    x = jax.random.normal(k1, (N, CIN, H, W), jnp.float32)
    # Deterministic synthetic parameters (shapes from FCT.__init__).
    w_dw = jax.random.normal(k2, (CIN, 1, 4, 4), jnp.float32) * 0.25        # dw conv
    w_pw = jax.random.normal(k3, (COUT, 3 * CIN, 1, 1), jnp.float32) * 0.2  # pw conv
    gamma = 1.0 + 0.1 * jax.random.normal(k4, (COUT,), jnp.float32)         # bn weight
    beta = 0.1 * jax.random.normal(k5, (COUT,), jnp.float32)                # bn bias

    out = fct_forward(x, w_dw, w_pw, gamma, beta)
    out = jax.block_until_ready(out)

    ref = fct_reference(x, w_dw, w_pw, gamma, beta)
    if not bool(jnp.allclose(out, ref, rtol=1e-4, atol=1e-4)):
        raise AssertionError(
            f"mismatch vs reference, max abs diff = {float(jnp.max(jnp.abs(out - ref)))}")

    print("KERNEL_OK")
</pallas_src>

<mosaic_0001>
module attributes {stable_mosaic.version = 11 : i64} {
  func.func @fct_feature_kernel(%arg0: i32, %arg1: memref<1x16x9x9xf32, #tpu.memory_space<vmem>>, %arg2: memref<4x8x16xf32, #tpu.memory_space<vmem>>, %arg3: memref<8x4xf32, #tpu.memory_space<vmem>>, %arg4: memref<8x4xf32, #tpu.memory_space<vmem>>, %arg5: memref<1x8x64xf32, #tpu.memory_space<vmem>>, %arg6: memref<1x8x2xf32, #tpu.memory_space<vmem>>) attributes {dimension_semantics = [#tpu.dimension_semantics<parallel>], iteration_bounds = array<i64: 2>, scalar_prefetch = 0 : i64, scratch_operands = 0 : i64, tpu.core_type = #tpu.core_type<tc>, window_params = [{transform_indices = @transform_0, window_bounds = array<i64: 1, 16, 9, 9>}, {pipeline_mode = #tpu.pipeline_mode<synchronous>, transform_indices = @transform_1, window_bounds = array<i64: 4, 8, 16>}, {pipeline_mode = #tpu.pipeline_mode<synchronous>, transform_indices = @transform_2, window_bounds = array<i64: 8, 4>}, {pipeline_mode = #tpu.pipeline_mode<synchronous>, transform_indices = @transform_3, window_bounds = array<i64: 8, 4>}, {transform_indices = @transform_4, window_bounds = array<i64: 1, 8, 64>}, {transform_indices = @transform_5, window_bounds = array<i64: 1, 8, 2>}]} {
    %cst = arith.constant 0.000000e+00 : f32
    %0 = vector.broadcast %cst : f32 to vector<8x1xf32>
    %cst_0 = arith.constant 0.000000e+00 : f32
    %1 = vector.broadcast %cst_0 : f32 to vector<8x1xf32>
    %c0 = arith.constant 0 : index
    %c0_1 = arith.constant 0 : index
    %c0_2 = arith.constant 0 : index
    %c0_3 = arith.constant 0 : index
    %2 = vector.load %arg1[%c0, %c0_1, %c0_2, %c0_3] : memref<1x16x9x9xf32, #tpu.memory_space<vmem>>, vector<1x16x8x8xf32>
    %3 = vector.shape_cast %2 : vector<1x16x8x8xf32> to vector<16x8x8xf32>
    %4 = vector.shape_cast %3 : vector<16x8x8xf32> to vector<16x64xf32>
    %c0_4 = arith.constant 0 : index
    %c0_5 = arith.constant 0 : index
    %c0_6 = arith.constant 0 : index
    %c1 = arith.constant 1 : index
    %5 = vector.load %arg1[%c0_4, %c0_5, %c0_6, %c1] : memref<1x16x9x9xf32, #tpu.memory_space<vmem>>, vector<1x16x8x8xf32>
    %6 = vector.shape_cast %5 : vector<1x16x8x8xf32> to vector<16x8x8xf32>
    %7 = vector.shape_cast %6 : vector<16x8x8xf32> to vector<16x64xf32>
    %c0_7 = arith.constant 0 : index
    %c0_8 = arith.constant 0 : index
    %c1_9 = arith.constant 1 : index
    %c0_10 = arith.constant 0 : index
    %8 = vector.load %arg1[%c0_7, %c0_8, %c1_9, %c0_10] : memref<1x16x9x9xf32, #tpu.memory_space<vmem>>, vector<1x16x8x8xf32>
    %9 = vector.shape_cast %8 : vector<1x16x8x8xf32> to vector<16x8x8xf32>
    %10 = vector.shape_cast %9 : vector<16x8x8xf32> to vector<16x64xf32>
    %c0_11 = arith.constant 0 : index
    %c0_12 = arith.constant 0 : index
    %c1_13 = arith.constant 1 : index
    %c1_14 = arith.constant 1 : index
    %11 = vector.load %arg1[%c0_11, %c0_12, %c1_13, %c1_14] : memref<1x16x9x9xf32, #tpu.memory_space<vmem>>, vector<1x16x8x8xf32>
    %12 = vector.shape_cast %11 : vector<1x16x8x8xf32> to vector<16x8x8xf32>
    %13 = vector.shape_cast %12 : vector<16x8x8xf32> to vector<16x64xf32>
    %14 = vector.extract_strided_slice %4 {offsets = [12, 0], sizes = [4, 64], strides = [1, 1]} : vector<16x64xf32> to vector<4x64xf32>
    %15 = vector.extract_strided_slice %7 {offsets = [8, 0], sizes = [4, 64], strides = [1, 1]} : vector<16x64xf32> to vector<4x64xf32>
    %16 = vector.extract_strided_slice %10 {offsets = [4, 0], sizes = [4, 64], strides = [1, 1]} : vector<16x64xf32> to vector<4x64xf32>
    %17 = vector.extract_strided_slice %13 {offsets = [0, 0], sizes = [4, 64], strides = [1, 1]} : vector<16x64xf32> to vector<4x64xf32>
    %18 = arith.maximumf %14, %15 : vector<4x64xf32>
    %19 = arith.maximumf %16, %17 : vector<4x64xf32>
    %20 = arith.maximumf %18, %19 : vector<4x64xf32>
    %21 = arith.minimumf %14, %15 : vector<4x64xf32>
    %22 = arith.minimumf %16, %17 : vector<4x64xf32>
    %23 = arith.minimumf %21, %22 : vector<4x64xf32>
    %c0_15 = arith.constant 0 : index
    %c0_16 = arith.constant 0 : index
    %24 = vector.load %arg3[%c0_15, %c0_16] : memref<8x4xf32, #tpu.memory_space<vmem>>, vector<8x4xf32>
    %cst_17 = arith.constant dense<0.000000e+00> : vector<8x64xf32>
    %25 = tpu.matmul %24, %20, %cst_17 {dimension_numbers = #tpu.dot_dimension_numbers<[1], [0], [0], [1], [0, 0, 1, 1], [], []>} : vector<8x4xf32>, vector<4x64xf32>, vector<8x64xf32> -> vector<8x64xf32>
    %c0_18 = arith.constant 0 : index
    %c0_19 = arith.constant 0 : index
    %26 = vector.load %arg4[%c0_18, %c0_19] : memref<8x4xf32, #tpu.memory_space<vmem>>, vector<8x4xf32>
    %cst_20 = arith.constant dense<0.000000e+00> : vector<8x64xf32>
    %27 = tpu.matmul %26, %23, %cst_20 {dimension_numbers = #tpu.dot_dimension_numbers<[1], [0], [0], [1], [0, 0, 1, 1], [], []>} : vector<8x4xf32>, vector<4x64xf32>, vector<8x64xf32> -> vector<8x64xf32>
    %28 = arith.addf %25, %27 : vector<8x64xf32>
    %c0_21 = arith.constant 0 : index
    %c0_22 = arith.constant 0 : index
    %c0_23 = arith.constant 0 : index
    %29 = vector.load %arg2[%c0_21, %c0_22, %c0_23] : memref<4x8x16xf32, #tpu.memory_space<vmem>>, vector<1x8x16xf32>
    %30 = vector.shape_cast %29 : vector<1x8x16xf32> to vector<8x16xf32>
    %cst_24 = arith.constant dense<0.000000e+00> : vector<8x64xf32>
    %31 = tpu.matmul %30, %4, %cst_24 {dimension_numbers = #tpu.dot_dimension_numbers<[1], [0], [0], [1], [0, 0, 1, 1], [], []>} : vector<8x16xf32>, vector<16x64xf32>, vector<8x64xf32> -> vector<8x64xf32>
    %32 = arith.addf %28, %31 : vector<8x64xf32>
    %c1_25 = arith.constant 1 : index
    %c0_26 = arith.constant 0 : index
    %c0_27 = arith.constant 0 : index
    %33 = vector.load %arg2[%c1_25, %c0_26, %c0_27] : memref<4x8x16xf32, #tpu.memory_space<vmem>>, vector<1x8x16xf32>
    %34 = vector.shape_cast %33 : vector<1x8x16xf32> to vector<8x16xf32>
    %cst_28 = arith.constant dense<0.000000e+00> : vector<8x64xf32>
    %35 = tpu.matmul %34, %7, %cst_28 {dimension_numbers = #tpu.dot_dimension_numbers<[1], [0], [0], [1], [0, 0, 1, 1], [], []>} : vector<8x16xf32>, vector<16x64xf32>, vector<8x64xf32> -> vector<8x64xf32>
    %36 = arith.addf %32, %35 : vector<8x64xf32>
    %c2 = arith.constant 2 : index
    %c0_29 = arith.constant 0 : index
    %c0_30 = arith.constant 0 : index
    %37 = vector.load %arg2[%c2, %c0_29, %c0_30] : memref<4x8x16xf32, #tpu.memory_space<vmem>>, vector<1x8x16xf32>
    %38 = vector.shape_cast %37 : vector<1x8x16xf32> to vector<8x16xf32>
    %cst_31 = arith.constant dense<0.000000e+00> : vector<8x64xf32>
    %39 = tpu.matmul %38, %10, %cst_31 {dimension_numbers = #tpu.dot_dimension_numbers<[1], [0], [0], [1], [0, 0, 1, 1], [], []>} : vector<8x16xf32>, vector<16x64xf32>, vector<8x64xf32> -> vector<8x64xf32>
    %40 = arith.addf %36, %39 : vector<8x64xf32>
    %c3 = arith.constant 3 : index
    %c0_32 = arith.constant 0 : index
    %c0_33 = arith.constant 0 : index
    %41 = vector.load %arg2[%c3, %c0_32, %c0_33] : memref<4x8x16xf32, #tpu.memory_space<vmem>>, vector<1x8x16xf32>
    %42 = vector.shape_cast %41 : vector<1x8x16xf32> to vector<8x16xf32>
    %cst_34 = arith.constant dense<0.000000e+00> : vector<8x64xf32>
    %43 = tpu.matmul %42, %13, %cst_34 {dimension_numbers = #tpu.dot_dimension_numbers<[1], [0], [0], [1], [0, 0, 1, 1], [], []>} : vector<8x16xf32>, vector<16x64xf32>, vector<8x64xf32> -> vector<8x64xf32>
    %44 = arith.addf %40, %43 : vector<8x64xf32>
    %c0_35 = arith.constant 0 : index
    %c0_36 = arith.constant 0 : index
    %c0_37 = arith.constant 0 : index
    %45 = vector.load %arg5[%c0_35, %c0_36, %c0_37] : memref<1x8x64xf32, #tpu.memory_space<vmem>>, vector<1x8x64xf32>
    %46 = vector.shape_cast %45 : vector<1x8x64xf32> to vector<8x64xf32>
    %47 = vector.shape_cast %44 : vector<8x64xf32> to vector<1x8x64xf32>
    tpu.vector_store %arg5[%c0_35, %c0_36, %c0_37], %47 {strides = array<i32>} : memref<1x8x64xf32, #tpu.memory_space<vmem>>, vector<1x8x64xf32>,
    %cst_38 = arith.constant dense<0.000000e+00> : vector<8xf32>
    %48 = vector.multi_reduction <add>, %44, %cst_38 [1] : vector<8x64xf32> to vector<8xf32>
    %49 = vector.shape_cast %48 : vector<8xf32> to vector<8x1xf32>
    %50 = arith.addf %0, %49 : vector<8x1xf32>
    %51 = arith.mulf %44, %44 : vector<8x64xf32>
    %cst_39 = arith.constant dense<0.000000e+00> : vector<8xf32>
    %52 = vector.multi_reduction <add>, %51, %cst_39 [1] : vector<8x64xf32> to vector<8xf32>
    %53 = vector.shape_cast %52 : vector<8xf32> to vector<8x1xf32>
    %54 = arith.addf %1, %53 : vector<8x1xf32>
    %c0_40 = arith.constant 0 : index
    %c0_41 = arith.constant 0 : index
    %c0_42 = arith.constant 0 : index
    %55 = vector.load %arg6[%c0_40, %c0_41, %c0_42] : memref<1x8x2xf32, #tpu.memory_space<vmem>>, vector<1x8x1xf32>
    %56 = vector.shape_cast %55 : vector<1x8x1xf32> to vector<8x1xf32>
    %57 = vector.shape_cast %50 : vector<8x1xf32> to vector<1x8x1xf32>
    tpu.vector_store %arg6[%c0_40, %c0_41, %c0_42], %57 {strides = array<i32>} : memref<1x8x2xf32, #tpu.memory_space<vmem>>, vector<1x8x1xf32>,
    %c0_43 = arith.constant 0 : index
    %c0_44 = arith.constant 0 : index
    %c1_45 = arith.constant 1 : index
    %58 = vector.load %arg6[%c0_43, %c0_44, %c1_45] : memref<1x8x2xf32, #tpu.memory_space<vmem>>, vector<1x8x1xf32>
    %59 = vector.shape_cast %58 : vector<1x8x1xf32> to vector<8x1xf32>
    %60 = vector.shape_cast %54 : vector<8x1xf32> to vector<1x8x1xf32>
    tpu.vector_store %arg6[%c0_43, %c0_44, %c1_45], %60 {strides = array<i32>} : memref<1x8x2xf32, #tpu.memory_space<vmem>>, vector<1x8x1xf32>,
    return
  }
  func.func @transform_0(%arg0: i32) -> (i32, i32, i32, i32) {
    %c0_i32 = arith.constant 0 : i32
    %c0_i32_0 = arith.constant 0 : i32
    %c0_i32_1 = arith.constant 0 : i32
    %c0_i32_2 = arith.constant 0 : i32
    return %arg0, %c0_i32, %c0_i32_0, %c0_i32_1 : i32, i32, i32, i32
  }
  func.func @transform_1(%arg0: i32) -> (i32, i32, i32) {
    %c0_i32 = arith.constant 0 : i32
    %c0_i32_0 = arith.constant 0 : i32
    %c0_i32_1 = arith.constant 0 : i32
    %c0_i32_2 = arith.constant 0 : i32
    return %c0_i32, %c0_i32_0, %c0_i32_1 : i32, i32, i32
  }
  func.func @transform_2(%arg0: i32) -> (i32, i32) {
    %c0_i32 = arith.constant 0 : i32
    %c0_i32_0 = arith.constant 0 : i32
    %c0_i32_1 = arith.constant 0 : i32
    return %c0_i32, %c0_i32_0 : i32, i32
  }
  func.func @transform_3(%arg0: i32) -> (i32, i32) {
    %c0_i32 = arith.constant 0 : i32
    %c0_i32_0 = arith.constant 0 : i32
    %c0_i32_1 = arith.constant 0 : i32
    return %c0_i32, %c0_i32_0 : i32, i32
  }
  func.func @transform_4(%arg0: i32) -> (i32, i32, i32) {
    %c0_i32 = arith.constant 0 : i32
    %c0_i32_0 = arith.constant 0 : i32
    %c0_i32_1 = arith.constant 0 : i32
    return %arg0, %c0_i32, %c0_i32_0 : i32, i32, i32
  }
  func.func @transform_5(%arg0: i32) -> (i32, i32, i32) {
    %c0_i32 = arith.constant 0 : i32
    %c0_i32_0 = arith.constant 0 : i32
    %c0_i32_1 = arith.constant 0 : i32
    return %arg0, %c0_i32, %c0_i32_0 : i32, i32, i32
  }
}

</mosaic_0001>

<bundles_post_ra>
// kernel: tpu_custom_call.1
= control target key start
LH: loop header
LB: loop body
LE: loop exit
PB: predicated region body
PF: predicated region fallthrough
CT: control target
= control target key end

     0   :  { %11 = vsyncpa [#allocation3], 0  ;;  %s3730_s0 = inlined_call_operand.vmem [shape: f32[2,16,9,9], index: 0, kind: input, shape index: {}]   ;;  %s3731_s1 = inlined_call_operand.vmem [shape: f32[4,8,16], index: 1, kind: input, shape index: {}]   ;;  %s3732_s2 = inlined_call_operand.vmem [shape: f32[8,4], index: 2, kind: input, shape index: {}]   ;;  %s3733_s3 = inlined_call_operand.vmem [shape: f32[8,4], index: 3, kind: input, shape index: {}]   ;;  %s3734_s4 = inlined_call_operand.hbm [shape: f32[2,8,64], index: 4, kind: output, shape index: {0}]   ;;  %s3735_s5 = inlined_call_operand.vmem [shape: f32[2,8,2], index: 5, kind: output, shape index: {1}]  }
   0x1   :  { %13 = vsyncpa [#allocation3 + $0x1], 0  ;;  %s2683_s18 = smov 0   ;;  %s2685_s19 = smov 0  }
   0x2   :  { %s2687_s20 = smov 0   ;;  %s2689_s21 = smov 0  }
   0x3 LB: > { %s2704_s22 = sadd.s32 4294967295, %s2637_s21   ;;  %s2361_s23 = sadd.s32 4294967294, %s2637_s21   ;;  %s2637_s21 = sphi %s2689_s21, %s3742_s21   ;;  %s2633_s20 = sphi %s2687_s20, %s3741_s20   ;;  %s2629_s19 = sphi %s2685_s19, %s3740_s19   ;;  %s2625_s18 = sphi %s2683_s18, %s3739_s18  }
   0x4   : > { %s2708_s24 = sadd.s32 1, %s2637_s21   ;;  %s115_s25 = sadd.s32 1, %s2633_s20 }
   0x5   : > { %s112_s26 = ssub.s32 %s2637_s21, %s2708_s24  ;;  %p125_p0 = scmp.ne.s32.totalorder %s2633_s20, %s2629_s19 }
   0x6   : > { %p113_p1 = scmp.eq.s32.totalorder %s112_s26, 0  ;;  %p126_p2 = scmp.eq.s32.totalorder %s2704_s22, 1 }
   0x7   : > { %p131_p3 = scmp.ne.s32.totalorder %s2629_s19, %s2625_s18  ;;  %p132_p4 = scmp.eq.s32.totalorder %s2361_s23, 1 }
   0x8   : > { %s2719_s27 = scalar_select %p113_p1, %s2633_s20, %s115_s25  }
   0x9   : > { %p2721_p5 = por %p126_p2, %p125_p0  ;;  %p2725_p6 = por %p132_p4, %p131_p3 }
   0xa   : > { %p2364_p7 = scmp.ge.s32.totalorder %s2637_s21, 1  ;;  %p193_p8 = scmp.lt.s32.totalorder %s2637_s21, 3 }
   0xc   : > { %p194_p9 = pnand %p2364_p7, %p193_p8 }
   0xd   : > { %p225_p10 = scmp.lt.s32.totalorder (!%p194_p9), %s2704_s22, 1  ;;  %s2639_s10 = smov (!%p194_p9), 127   ;;  %v2640_v4 = vmov (!%p194_p9), 1983009808   ;;  %v255_v6 = vlaneseq (!%p194_p9)  ;;  %v2641_v57 = vmov (!%p194_p9), 1934713408  }
   0xe   : > { %197 = sbr.rel (%p194_p9) target bundleno = 728 (0x2d8), region = 36  ;;  %v253_v5 = vunpack.c.l.s4 (!%p194_p9), %v2640_v4  ;;  %v317_v58 = vunpack.c.l.s4 (!%p194_p9), %v2641_v57  ;;  %s2642_s11 = smov (!%p194_p9), 8   ;;  %vm578_vm0 = vcmask (!%p194_p9), 64512   ;;  %vm2650_vm1 = vmmov (!%p194_p9), 0  }
   0xf   : > { %v2767_v10 = vshrl.u32 (!%p194_p9), %v255_v6, 7  ;;  %s2643_s12 = smov (!%p194_p9), 48   ;;  %s2644_s13 = smov (!%p194_p9), 56   ;;  %vm581_vm2 = vcmask (!%p194_p9), 130048   ;;  %vm584_vm3 = vcmask (!%p194_p9), 195584   ;;  %vm587_vm4 = vcmask (!%p194_p9), 261120  }
  0x10   : > { %v254_v9 = vunpack.c.0.s8 (!%p194_p9), %v253_v5  ;;  %s2645_s14 = smov (!%p194_p9), 16   ;;  %s2646_s15 = smov (!%p194_p9), 32   ;;  %vm590_vm5 = vcmask (!%p194_p9), 326656   ;;  %vm593_vm6 = vcmask (!%p194_p9), 392192   ;;  %vm596_vm7 = vcmask (!%p194_p9), 457728  }
  0x11   : > { %s2647_s16 = smov (!%p194_p9), 24   ;;  %s2648_s17 = smov (!%p194_p9), 40   ;;  %vm1789_vm8 = vcmask (!%p194_p9), 1043456   ;;  %vm1785_vm9 = vcmask (!%p194_p9), 31744   ;;  %vm2242_vm10 = vcmask (!%p194_p9), 523264  }
  0x12   : > { %v2800_v20 = vsub.s32 (!%p194_p9), %v254_v9, %v2767_v10  ;;  %s2381_s23 = sshll.u32 (!%p194_p9), %s2704_s22, 7 }
  0x13   : > { %s3690_s7 = scalar_lea.hbm (!%p194_p9), %s3734_s4, %s2381_s23 }
  0x15   : > { %s2733_s30 = scalar_select %p225_p10, %s2704_s22, 1 }
  0x17   : > { %s2384_s6 = sshll.u32 %s2733_s30, 8 }
  0x18   : > { %s2739_s9 = scalar_lea.vmem %s3730_s0, %s2384_s6 }
  0x19   : > { %v2742_v0 = vld [vmem:[%s2739_s9 + $0xa0] sm:$0xff]  ;;  %v2752_v2 = vld [vmem:[%s2739_s9 + $0xb0] sm:$0xff] }
  0x1a   : > { %v2745_v1 = vld [vmem:[%s2739_s9 + $0x80] sm:$0xff]  ;;  %635 = vrot.lane.b32.xlu1 %v2742_v0, %s2639_s10  ;;  %v2755_v3 = vld [vmem:[%s2739_s9 + $0x90] sm:$0xff] }
  0x1b   : > { %631 = vrot.lane.b32.xlu0 %v2745_v1, %s2639_s10  ;;  %v2762_v7 = vld [vmem:[%s2739_s9 + $0xd0] sm:$0xff]  ;;  %v2765_v8 = vld [vmem:[%s2739_s9 + $0xc0] sm:$0xff] }
  0x1c   : > { %v2770_v11 = vld [vmem:[%s2739_s9 + $0xf0] sm:$0xff]  ;;  %v2773_v12 = vld [vmem:[%s2739_s9 + $0xe0] sm:$0xff] }
  0x1d   : > { %v2776_v13 = vld [vmem:[%s2739_s9 + $0x10] sm:$0xff]  ;;  %v2783_v14 = vld [vmem:[%s2739_s9] sm:$0xff] }
  0x1e   : > { %637 = vrot.lane.b32.xlu1 %v2752_v2, %s2639_s10  ;;  %v2786_v15 = vld [vmem:[%s2739_s9 + $0x30] sm:$0xff]  ;;  %v2791_v17 = vld [vmem:[%s2739_s9 + $0x20] sm:$0xff] }
  0x1f   : > { %633 = vrot.lane.b32.xlu0 %v2755_v3, %s2639_s10  ;;  %v267_v16 = vcombine.high %v2776_v13, %v2786_v15  ;;  %v2794_v18 = vld [vmem:[%s2739_s9 + $0x50] sm:$0xff]  ;;  %v251_v21 = vcombine.high %v2783_v14, %v2791_v17  ;;  %v2805_v22 = vld [vmem:[%s2739_s9 + $0x40] sm:$0xff]  ;;  %v266_v47 = vcombine.low %v2776_v13, %v2786_v15  ;;  %v250_v48 = vcombine.low %v2783_v14, %v2791_v17 }
  0x20   : > { %v2797_v19 = vld [vmem:[%s2739_s9 + $0x70] sm:$0xff]  ;;  %v2810_v24 = vld [vmem:[%s2739_s9 + $0x60] sm:$0xff] }
  0x21   : > { %v299_v23 = vcombine.high %v2794_v18, %v2797_v19  ;;  %v283_v25 = vcombine.high %v2805_v22, %v2810_v24  ;;  %v2819_v26 = vrot.slane %v267_v16, %v2800_v20  ;;  %v2822_v27 = vrot.slane %v251_v21, %v2800_v20  ;;  %v2825_v28 = vld [vmem:[%s2739_s9 + $0x11] sm:$0xff]  ;;  %v2828_v29 = vld [vmem:[%s2739_s9 + $0x1] sm:$0xff] }
  0x22   : > { %641 = vrot.lane.b32.xlu1 %v2762_v7, %s2639_s10  ;;  %v2839_v33 = vld [vmem:[%s2739_s9 + $0x91] sm:$0xff]  ;;  %v2847_v36 = vld [vmem:[%s2739_s9 + $0x81] sm:$0xff]  ;;  %v298_v50 = vcombine.low %v2794_v18, %v2797_v19  ;;  %v282_v51 = vcombine.low %v2805_v22, %v2810_v24  ;;  %v2916_v6 = vrot.slane %v266_v47, %v2800_v20  ;;  %v2919_v9 = vrot.slane %v250_v48, %v2800_v20 }
  0x23   : > { %639 = vrot.lane.b32.xlu0 %v2765_v8, %s2639_s10  ;;  %v2831_v30 = vrot.slane %v299_v23, %v2800_v20  ;;  %v2834_v31 = vrot.slane %v283_v25, %v2800_v20  ;;  %v331_v32 = vcombine.high %v2822_v27, %v2819_v26  ;;  %v2842_v34 = vld [vmem:[%s2739_s9 + $0x31] sm:$0xff]  ;;  %v2853_v38 = vld [vmem:[%s2739_s9 + $0xa1] sm:$0xff]  ;;  %v318_v23 = vunpack.c.0.s8 %v317_v58 }
  0x24   : > { %v2850_v37 = vld [vmem:[%s2739_s9 + $0xb1] sm:$0xff]  ;;  %v2868_v42 = vld [vmem:[%s2739_s9 + $0x21] sm:$0xff]  ;;  %v1158_v43 = vcombine.high %v2847_v36, %v2853_v38  ;;  %v1157_v61 = vcombine.low %v2847_v36, %v2853_v38  ;;  %v2922_v16 = vrot.slane %v298_v50, %v2800_v20  ;;  %v2925_v21 = vrot.slane %v282_v51, %v2800_v20 }
  0x25   : > { %v363_v35 = vcombine.high %v2834_v31, %v2831_v30  ;;  %v1174_v39 = vcombine.high %v2839_v33, %v2850_v37  ;;  %v2862_v40 = vld [vmem:[%s2739_s9 + $0xd1] sm:$0xff]  ;;  %v2873_v44 = vld [vmem:[%s2739_s9 + $0xc1] sm:$0xff]  ;;  %v1173_v54 = vcombine.low %v2839_v33, %v2850_v37  ;;  %v2962_v57 = vsub.s32 %v318_v23, %v2767_v10 }
  0x26   : > { %645 = vrot.lane.b32.xlu1 %v2770_v11, %s2639_s10  ;;  %v2865_v41 = vld [vmem:[%s2739_s9 + $0xf1] sm:$0xff]  ;;  %v2878_v46 = vld [vmem:[%s2739_s9 + $0xe1] sm:$0xff]  ;;  %v1172_v53 = vrot.slane %v1158_v43, %v2800_v20  ;;  %v346_v50 = vcombine.low %v2925_v21, %v2922_v16  ;;  %v330_v23 = vcombine.low %v2822_v27, %v2819_v26 }
  0x27   : > { %643 = vrot.lane.b32.xlu0 %v2773_v12, %s2639_s10  ;;  %v1206_v45 = vcombine.high %v2862_v40, %v2865_v41  ;;  %v1190_v49 = vcombine.high %v2873_v44, %v2878_v46  ;;  %v2891_v52 = vrot.slane %v1174_v39, %v2800_v20  ;;  %v2903_v59 = vld [vmem:[%s2739_s9 + $0x51] sm:$0xff]  ;;  %v2906_v60 = vld [vmem:[%s2739_s9 + $0x41] sm:$0xff]  ;;  %v1205_v63 = vcombine.low %v2862_v40, %v2865_v41 }
  0x28   : > { %v1189_v4 = vcombine.low %v2873_v44, %v2878_v46  ;;  %v2932_v25 = vld [vmem:[%s2739_s9 + $0x71] sm:$0xff]  ;;  %v2935_v39 = vld [vmem:[%s2739_s9 + $0x61] sm:$0xff]  ;;  %v2938_v43 = vrot.slane %v1173_v54, %v2800_v20 }
  0x29   : > { %v1220_v55 = vrot.slane %v1206_v45, %v2800_v20  ;;  %v1204_v56 = vrot.slane %v1190_v49, %v2800_v20  ;;  %v1238_v62 = vcombine.high %v1172_v53, %v2891_v52  ;;  %v2941_v45 = vrot.slane %v1157_v61, %v2800_v20 }
  0x2a   : > { %1381 = vrot.lane.b32.xlu1 %v2825_v28, %s2639_s10  ;;  %v2944_v47 = vrot.slane %v1205_v63, %v2800_v20  ;;  %v2947_v48 = vrot.slane %v1189_v4, %v2800_v20  ;;  %v314_v49 = vcombine.low %v2919_v9, %v2916_v6  ;;  %v2968_v61 = vrot.slane %v346_v50, %v2962_v57 }
  0x2b   : > { %1379 = vrot.lane.b32.xlu0 %v2828_v29, %s2639_s10  ;;  %v1270_v5 = vcombine.high %v1204_v56, %v1220_v55  ;;  %v1221_v51 = vcombine.low %v2941_v45, %v2938_v43  ;;  %v1269_v50 = vcombine.low %v1204_v56, %v1220_v55  ;;  %v1252_v26 = vrot.slane %v1238_v62, %v2962_v57 }
  0x2c   : > { %v1253_v54 = vcombine.low %v2947_v48, %v2944_v47  ;;  %v2965_v58 = vrot.slane %v314_v49, %v2962_v57  ;;  %v362_v49 = vcombine.low %v2834_v31, %v2831_v30  ;;  %v418_v56 = vcombine.low %v2765_v8, %v2773_v12 }
  0x2d   : > { %v2975_v63 = vrot.slane %v1221_v51, %v2962_v57  ;;  %v2994_v51 = vrot.slane %v330_v23, %v2962_v57  ;;  %v1284_v27 = vrot.slane %v1270_v5, %v2962_v57 }
  0x2e   : > { %1385 = vrot.lane.b32.xlu1 %v2842_v34, %s2639_s10  ;;  %v2978_v4 = vrot.slane %v1253_v54, %v2962_v57  ;;  %v2997_v54 = vrot.slane %v362_v49, %v2962_v57  ;;  %v1037_v49 = vcombine.low %v2825_v28, %v2842_v34 }
  0x2f   : > { %1383 = vrot.lane.b32.xlu0 %v2868_v42, %s2639_s10  ;;  %v1291_v31 = vcombine.low %v1252_v26, %v1284_v27 }
  0x30   : > { %v383_v55 = vcombine.high %v2994_v51, %v2997_v54 }
  0x32   : > { %1389 = vrot.lane.b32.xlu1 %v2903_v59, %s2639_s10 }
  0x33   : > { %1387 = vrot.lane.b32.xlu0 %v2906_v60, %s2639_s10 }
  0x36   : > { %1393 = vrot.lane.b32.xlu1 %v2932_v25, %s2639_s10 }
  0x37   : > { %1391 = vrot.lane.b32.xlu0 %v2935_v39, %s2639_s10 }
  0x3a   : > { %617 = vrot.lane.b32.xlu1 %v2776_v13, %s2639_s10  ;;  %v1237_v13 = vcombine.low %v1172_v53, %v2891_v52  ;;  %v3003_v52 = vrot.slane %v1269_v50, %v2962_v57  ;;  %v402_v53 = vcombine.low %v2755_v3, %v2752_v2  ;;  %v1038_v50 = vcombine.high %v2825_v28, %v2842_v34 }
  0x3b   : > { %615 = vrot.lane.b32.xlu0 %v2783_v14, %s2639_s10  ;;  %v1285_v14 = vcombine.low %v2975_v63, %v2978_v4  ;;  %v426_v34 = vrot.slane %v418_v56, %v2800_v20 }
  0x3c   : > { %v3000_v10 = vrot.slane %v1237_v13, %v2962_v57  ;;  %v3041_v5 = vrot.slane %v402_v53, %v2800_v20  ;;  %v1292_v13 = vcombine.high %v1252_v26, %v1284_v27  ;;  %v1070_v53 = vcombine.high %v2903_v59, %v2932_v25 }
  0x3e   : > { %621 = vrot.lane.b32.xlu1 %v2786_v15, %s2639_s10  ;;  %v345_v15 = vrot.slane %v331_v32, %v2962_v57  ;;  %v434_v32 = vcombine.low %v2762_v7, %v2770_v11 }
  0x3f   : > { %619 = vrot.lane.b32.xlu0 %v2791_v17, %s2639_s10  ;;  %v386_v17 = vcombine.low %v2745_v1, %v2742_v0 }
  0x40   : > { %v442_v28 = vrot.slane %v434_v32, %v2800_v20 }
  0x41   : > { %v3038_v62 = vrot.slane %v386_v17, %v2800_v20  ;;  %v1069_v17 = vcombine.low %v2903_v59, %v2932_v25  ;;  %v403_v59 = vcombine.high %v2755_v3, %v2752_v2  ;;  %v435_v25 = vcombine.high %v2762_v7, %v2770_v11 }
  0x42   : > { %625 = vrot.lane.b32.xlu1 %v2794_v18, %s2639_s10  ;;  %v1290_v18 = vcombine.high %v3000_v10, %v3003_v52 }
  0x43   : > { %623 = vrot.lane.b32.xlu0 %v2805_v22, %s2639_s10  ;;  %v377_v22 = vrot.slane %v363_v35, %v2962_v57  ;;  %v450_v7 = vcombine.low %v3038_v62, %v3041_v5 }
  0x44   : > { %v3031_v23 = vpack.i.bf16 %v1290_v18, %v383_v55  ;;  %v1053_v55 = vcombine.low %v2906_v60, %v2935_v39 }
  0x45   : > { %v384_v30 = vcombine.low %v345_v15, %v377_v22  ;;  %v385_v35 = vcombine.high %v345_v15, %v377_v22  ;;  %v419_v22 = vcombine.high %v2765_v8, %v2773_v12  ;;  %v482_v8 = vcombine.low %v426_v34, %v442_v28 }
  0x46   : > { %629 = vrot.lane.b32.xlu1 %v2797_v19, %s2639_s10  ;;  %v1021_v19 = vcombine.low %v2828_v29, %v2868_v42  ;;  %v1061_v2 = vrot.slane %v1053_v55, %v2800_v20  ;;  %v3103_v12 = vrot.slane %v403_v59, %v2800_v20 }
  0x47   : > { %627 = vrot.lane.b32.xlu0 %v2810_v24, %s2639_s10  ;;  %v1022_v24 = vcombine.high %v2828_v29, %v2868_v42  ;;  %v3051_v15 = vpack.i.bf16 %v1291_v31, %v384_v30  ;;  %v3059_v18 = vpack.i.bf16 %v1292_v13, %v385_v35  ;;  %v1054_v29 = vcombine.high %v2906_v60, %v2935_v39 }
  0x48   : > { %v387_v42 = vcombine.high %v2745_v1, %v2742_v0  ;;  %v1045_v60 = vrot.slane %v1037_v49, %v2800_v20  ;;  %v3079_v39 = vrot.slane %v1038_v50, %v2800_v20  ;;  %v1077_v0 = vrot.slane %v1069_v17, %v2800_v20 }
  0x49   : > { %v3087_v1 = vrot.slane %v1070_v53, %v2800_v20  ;;  %v3091_v3 = vrot.slane %v1054_v29, %v2800_v20  ;;  %v3120_v30 = vrot.slane %v450_v7, %v2962_v57  ;;  %v3123_v31 = vrot.slane %v482_v8, %v2962_v57 }
  0x4a   : > { %1397 = vrot.lane.b32.xlu1 %v2839_v33, %s2639_s10  ;;  %v1029_v33 = vrot.slane %v1021_v19, %v2800_v20  ;;  %v3100_v11 = vrot.slane %v387_v42, %v2800_v20  ;;  %v1117_v56 = vcombine.low %v1061_v2, %v1077_v0  ;;  %v315_v35 = vcombine.high %v2919_v9, %v2916_v6 }
  0x4b   : > { %1395 = vrot.lane.b32.xlu0 %v2847_v36, %s2639_s10  ;;  %v3083_v36 = vrot.slane %v1022_v24, %v2800_v20  ;;  %v1134_v27 = vcombine.high %v3091_v3, %v3087_v1  ;;  %v347_v49 = vcombine.high %v2925_v21, %v2922_v16  ;;  %v1254_v50 = vcombine.high %v2947_v48, %v2944_v47 }
  0x4c   : > { %v1085_v32 = vcombine.low %v1029_v33, %v1045_v60  ;;  %v467_v13 = vcombine.high %v3100_v11, %v3103_v12  ;;  %v3147_v16 = vrot.slane %v1117_v56, %v2962_v57  ;;  %v451_v21 = vcombine.high %v3038_v62, %v3041_v5 }
  0x4d   : > { %v1102_v26 = vcombine.high %v3083_v36, %v3079_v39  ;;  %v3141_v6 = vrot.slane %v1134_v27, %v2962_v57  ;;  %v483_v24 = vcombine.high %v426_v34, %v442_v28  ;;  %v1086_v47 = vcombine.high %v1029_v33, %v1045_v60 }
  0x4e   : > { %1401 = vrot.lane.b32.xlu1 %v2850_v37, %s2639_s10  ;;  %v3110_v37 = vrot.slane %v435_v25, %v2800_v20  ;;  %v3144_v9 = vrot.slane %v1085_v32, %v2962_v57  ;;  %v481_v48 = vrot.slane %v467_v13, %v2962_v57  ;;  %v3162_v62 = vrot.slane %v315_v35, %v2962_v57 }
  0x4f   : > { %1399 = vrot.lane.b32.xlu0 %v2853_v38, %s2639_s10  ;;  %v3113_v38 = vrot.slane %v419_v22, %v2800_v20  ;;  %v3138_v19 = vrot.slane %v1102_v26, %v2962_v57  ;;  %v3165_v5 = vrot.slane %v347_v49, %v2962_v57  ;;  %v465_v55 = vrot.slane %v451_v21, %v2962_v57 }
  0x50   : > { %v1150_v53 = vcombine.high %v3144_v9, %v3147_v16  ;;  %v497_v28 = vrot.slane %v483_v24, %v2962_v57  ;;  %v1118_v34 = vcombine.high %v1061_v2, %v1077_v0  ;;  %v514_v25 = vcombine.low %v3120_v30, %v3123_v31 }
  0x51   : > { %v380_v42 = vcombine.low %v3162_v62, %v3165_v5  ;;  %v1100_v60 = vrot.slane %v1086_v47, %v2962_v57  ;;  %v382_v2 = vcombine.low %v2994_v51, %v2997_v54  ;;  %v1289_v7 = vcombine.low %v3000_v10, %v3003_v52 }
  0x52   : > { %1405 = vrot.lane.b32.xlu1 %v2862_v40, %s2639_s10  ;;  %v499_v40 = vcombine.high %v3113_v38, %v3110_v37  ;;  %v516_v22 = vcombine.low %v465_v55, %v497_v28  ;;  %v1132_v33 = vrot.slane %v1118_v34, %v2962_v57  ;;  %v1149_v8 = vcombine.low %v3144_v9, %v3147_v16 }
  0x53   : > { %1403 = vrot.lane.b32.xlu0 %v2873_v44, %s2639_s10  ;;  %v1222_v44 = vcombine.high %v2941_v45, %v2938_v43  ;;  %v515_v43 = vcombine.high %v3120_v30, %v3123_v31  ;;  %v1155_v45 = vcombine.low %v3138_v19, %v3141_v6  ;;  %v2525_v27 = vpack.i.bf16 %v1289_v7, %v382_v2 }
  0x54   : > { %v513_v17 = vrot.slane %v499_v40, %v2962_v57  ;;  %v1151_v26 = vcombine.low %v1100_v60, %v1132_v33  ;;  %v517_v32 = vcombine.high %v465_v55, %v497_v28  ;;  %v466_v56 = vcombine.low %v3100_v11, %v3103_v12 }
  0x55   : > { %v498_v51 = vcombine.low %v3113_v38, %v3110_v37  ;;  %v1152_v10 = vcombine.high %v1100_v60, %v1132_v33  ;;  %v1101_v35 = vcombine.low %v3083_v36, %v3079_v39  ;;  %v1133_v11 = vcombine.low %v3091_v3, %v3087_v1 }
  0x56   : > { %1409 = vrot.lane.b32.xlu1 %v2865_v41, %s2639_s10  ;;  %v3168_v41 = vrot.slane %v1222_v44, %v2962_v57  ;;  %v521_v29 = vcombine.high %v481_v48, %v513_v17  ;;  %v474_v54 = vrot.slane %v466_v56, %v2962_v57  ;;  %v520_v36 = vcombine.low %v481_v48, %v513_v17 }
  0x57   : > { %1407 = vrot.lane.b32.xlu0 %v2878_v46, %s2639_s10  ;;  %v3171_v46 = vrot.slane %v1254_v50, %v2962_v57  ;;  %v506_v52 = vrot.slane %v498_v51, %v2962_v57  ;;  %v1109_v37 = vrot.slane %v1101_v35, %v2962_v57  ;;  %v1141_v38 = vrot.slane %v1133_v11, %v2962_v57  ;;  %s2652_s10 = smov [#allocation2]  }
  0x58   : > { %v379_v1 = vcombine.high %v2965_v58, %v2968_v61  ;;  %v1286_v3 = vcombine.high %v2975_v63, %v2978_v4  ;;  %v1156_v44 = vcombine.high %v3138_v19, %v3141_v6  ;;  %v381_v50 = vcombine.high %v3162_v62, %v3165_v5 }
  0x59   : > { %v1287_v59 = vcombine.low %v3168_v41, %v3171_v46  ;;  %v518_v12 = vcombine.low %v474_v54, %v506_v52  ;;  %v1153_v49 = vcombine.low %v1109_v37, %v1141_v38  ;;  %v519_v13 = vcombine.high %v474_v54, %v506_v52 }
  0x5a   : > { %1335 = vrot.lane.b32.xlu1 %v1155_v45, %s2643_s12  ;;  %v1154_v39 = vcombine.high %v1109_v37, %v1141_v38  ;;  %v2510_v40 = vpack.i.bf16 %v1286_v3, %v379_v1  ;;  %v1288_v21 = vcombine.high %v3168_v41, %v3171_v46 }
  0x5b   : > { %526 = vrot.lane.b32.xlu0 %v515_v43, %s2642_s11  ;;  %v2515_v0 = vpack.i.bf16 %v1287_v59, %v380_v42 }
  0x5c   : > { %v2520_v24 = vpack.i.bf16 %v1288_v21, %v381_v50 }
  0x5e   : > { %574 = vrot.lane.b32.xlu1 %v521_v29, %s2644_s13 }
  0x5f   : > { %1295 = vrot.lane.b32.xlu0 %v1150_v53, %s2642_s11 }
  0x62   : > { %2516 = vrot.lane.b32.xlu1 %v2515_v0, %s2645_s14 }
  0x63   : > { %534 = vrot.lane.b32.xlu0 %v516_v22, %s2645_s14 }
  0x66   : > { %2526 = vrot.lane.b32.xlu1 %v2525_v27, %s2646_s15 }
  0x67   : > { %1303 = vrot.lane.b32.xlu0 %v1151_v26, %s2645_s14 }
  0x6b   : > { %542 = vrot.lane.b32.xlu0 %v517_v32, %s2647_s16 }
  0x6f   : > { %1311 = vrot.lane.b32.xlu0 %v1152_v10, %s2647_s16 }
  0x73   : > { %550 = vrot.lane.b32.xlu0 %v518_v12, %s2646_s15 }
  0x77   : > { %1319 = vrot.lane.b32.xlu0 %v1153_v49, %s2646_s15 }
  0x7b   : > { %558 = vrot.lane.b32.xlu0 %v519_v13, %s2648_s17 }
  0x7f   : > { %1327 = vrot.lane.b32.xlu0 %v1154_v39, %s2648_s17 }
  0x83   : > { %566 = vrot.lane.b32.xlu0 %v520_v36, %s2643_s12 }
  0x87   : > { %2511 = vrot.lane.b32.xlu0 %v2510_v40, %s2642_s11 }
  0x8b   : > { %1343 = vrot.lane.b32.xlu0 %v1156_v44, %s2644_s13 }
  0x8c   : > { %v3230_v43 = vpop.permute.xlu1 %635 }
  0x8d   : > { %v3232_v45 = vpop.permute.xlu0 %631 }
  0x8e   : > { %v799_v62 = vcombine.low %v3232_v45, %v3230_v43 }
  0x8f   : > { %2521 = vrot.lane.b32.xlu0 %v2520_v24, %s2647_s16 }
  0x90   : > { %v3235_v47 = vpop.permute.xlu1 %637  ;;  %v807_v28 = vrot.slane %v799_v62, %v2800_v20 }
  0x91   : > { %v3237_v48 = vpop.permute.xlu0 %633 }
  0x92   : > { %v815_v19 = vcombine.low %v3237_v48, %v3235_v47 }
  0x94   : > { %v3241_v6 = vpop.permute.xlu1 %641  ;;  %v823_v5 = vrot.slane %v815_v19, %v2800_v20 }
  0x95   : > { %v3243_v17 = vpop.permute.xlu0 %639 }
  0x96   : > { %v863_v42 = vcombine.low %v807_v28, %v823_v5  ;;  %v864_v2 = vcombine.high %v807_v28, %v823_v5 }
  0x98   : > { %v3248_v41 = vpop.permute.xlu1 %645  ;;  %v3271_v27 = vrot.slane %v863_v42, %v2962_v57  ;;  %v3288_v35 = vrot.slane %v864_v2, %v2962_v57 }
  0x99   : > { %v3250_v46 = vpop.permute.xlu0 %643  ;;  %v847_v53 = vcombine.low %v3241_v6, %v3248_v41 }
  0x9a   : > { %v831_v55 = vcombine.low %v3243_v17, %v3250_v46 }
  0x9b   : > { %v855_v34 = vrot.slane %v847_v53, %v2800_v20 }
  0x9c   : > { %v839_v29 = vrot.slane %v831_v55, %v2800_v20  ;;  %v3259_v59 = vpop.permute.xlu1 %1381 }
  0x9d   : > { %v3261_v22 = vpop.permute.xlu0 %1379 }
  0x9e   : > { %v895_v60 = vcombine.low %v839_v29, %v855_v34  ;;  %v896_v33 = vcombine.high %v839_v29, %v855_v34  ;;  %v848_v34 = vcombine.high %v3241_v6, %v3248_v41  ;;  %v816_v6 = vcombine.high %v3237_v48, %v3235_v47 }
  0xa0   : > { %v3264_v0 = vrot.slane %v895_v60, %v2962_v57  ;;  %v3266_v7 = vpop.permute.xlu1 %1385  ;;  %v3276_v56 = vrot.slane %v896_v33, %v2962_v57  ;;  %v832_v33 = vcombine.high %v3243_v17, %v3250_v46 }
  0xa1   : > { %v3268_v26 = vpop.permute.xlu0 %1383  ;;  %v1443_v51 = vcombine.low %v3259_v59, %v3266_v7 }
  0xa2   : > { %v928_v32 = vcombine.high %v3271_v27, %v3264_v0  ;;  %v1427_v10 = vcombine.low %v3261_v22, %v3268_v26  ;;  %v927_v11 = vcombine.low %v3271_v27, %v3264_v0  ;;  %v929_v12 = vcombine.low %v3288_v35, %v3276_v56 }
  0xa3   : > { %v1451_v37 = vrot.slane %v1443_v51, %v2800_v20  ;;  %v800_v51 = vcombine.high %v3232_v45, %v3230_v43  ;;  %v3361_v45 = vrot.slane %v816_v6, %v2800_v20 }
  0xa4   : > { %939 = vrot.lane.b32.xlu0 %v928_v32, %s2642_s11  ;;  %v3283_v54 = vpop.permute.xlu1 %1389  ;;  %v1435_v38 = vrot.slane %v1427_v10, %v2800_v20  ;;  %v3348_v10 = vrot.slane %v848_v34, %v2800_v20 }
  0xa5   : > { %v3285_v52 = vpop.permute.xlu0 %1387 }
  0xa6   : > { %v1491_v40 = vcombine.low %v1435_v38, %v1451_v37  ;;  %v1492_v29 = vcombine.high %v1435_v38, %v1451_v37  ;;  %v3354_v37 = vrot.slane %v832_v33, %v2800_v20 }
  0xa8   : > { %947 = vrot.lane.b32.xlu0 %v929_v12, %s2645_s14  ;;  %v1394_v49 = vpop.permute.xlu1 %1393  ;;  %v3315_v5 = vrot.slane %v1491_v40, %v2962_v57  ;;  %v1506_v12 = vrot.slane %v1492_v29, %v2962_v57 }
  0xa9   : > { %v1392_v13 = vpop.permute.xlu0 %1391  ;;  %v1475_v39 = vcombine.low %v3283_v54, %v1394_v49  ;;  %v1476_v38 = vcombine.high %v3283_v54, %v1394_v49  ;;  %v3377_v54 = vrot.slane %v800_v51, %v2800_v20  ;;  %v930_v49 = vcombine.high %v3288_v35, %v3276_v56 }
  0xaa   : > { %v1459_v36 = vcombine.low %v3285_v52, %v1392_v13 }
  0xab   : > { %v1483_v1 = vrot.slane %v1475_v39, %v2800_v20 }
  0xac   : > { %v1467_v3 = vrot.slane %v1459_v36, %v2800_v20  ;;  %v3301_v44 = vpop.permute.xlu1 %617  ;;  %2531 = vrot.lane.b32.xlu0 %v3031_v23, %s2648_s17  ;;  %v1444_v36 = vcombine.high %v3259_v59, %v3266_v7  ;;  %v3387_v7 = vrot.slane %v1476_v38, %v2800_v20 }
  0xad   : > { %v3303_v50 = vpop.permute.xlu0 %615 }
  0xae   : > { %v1523_v21 = vcombine.low %v1467_v3, %v1483_v1  ;;  %v1524_v55 = vcombine.high %v1467_v3, %v1483_v1  ;;  %v1428_v1 = vcombine.high %v3261_v22, %v3268_v26 }
  0xb0   : > { %v3308_v24 = vrot.slane %v1523_v21, %v2962_v57  ;;  %v3310_v19 = vpop.permute.xlu1 %621  ;;  %2541 = vrot.lane.b32.xlu0 %v3059_v18, %s2644_s13  ;;  %v1538_v41 = vrot.slane %v1524_v55, %v2962_v57  ;;  %v3400_v55 = vrot.slane %v1428_v1, %v2800_v20 }
  0xb1   : > { %v3312_v62 = vpop.permute.xlu0 %619  ;;  %v679_v53 = vcombine.low %v3301_v44, %v3310_v19 }
  0xb2   : > { %v663_v23 = vcombine.low %v3303_v50, %v3312_v62  ;;  %v1556_v28 = vcombine.high %v3315_v5, %v3308_v24  ;;  %v1555_v18 = vcombine.low %v3315_v5, %v3308_v24  ;;  %v1557_v39 = vcombine.low %v1506_v12, %v1538_v41 }
  0xb3   : > { %v3337_v2 = vrot.slane %v679_v53, %v2800_v20 }
  0xb4   : > { %1701 = vrot.lane.b32.xlu1 %v1556_v28, %s2642_s11  ;;  %v3328_v42 = vpop.permute.xlu1 %625  ;;  %v3340_v32 = vrot.slane %v663_v23, %v2800_v20  ;;  %v3397_v23 = vrot.slane %v1444_v36, %v2800_v20 }
  0xb5   : > { %v3330_v60 = vpop.permute.xlu0 %623 }
  0xb6   : > { %v727_v47 = vcombine.low %v3340_v32, %v3337_v2  ;;  %v1507_v38 = vcombine.low %v3400_v55, %v3397_v23 }
  0xb8   : > { %2536 = vrot.lane.b32.xlu1 %v3051_v15, %s2643_s12  ;;  %v630_v17 = vpop.permute.xlu1 %629  ;;  %v1460_v15 = vcombine.high %v3285_v52, %v1392_v13  ;;  %v911_v52 = vcombine.low %v3354_v37, %v3348_v10  ;;  %v3382_v59 = vrot.slane %v727_v47, %v2962_v57  ;;  %v879_v13 = vcombine.low %v3377_v54, %v3361_v45 }
  0xb9   : > { %v628_v46 = vpop.permute.xlu0 %627  ;;  %v711_v48 = vcombine.low %v3328_v42, %v630_v17  ;;  %v712_v1 = vcombine.high %v3328_v42, %v630_v17 }
  0xba   : > { %v695_v43 = vcombine.low %v3330_v60, %v628_v46  ;;  %v3390_v26 = vrot.slane %v1460_v15, %v2800_v20  ;;  %v3409_v6 = vrot.slane %v911_v52, %v2962_v57  ;;  %v680_v15 = vcombine.high %v3301_v44, %v3310_v19 }
  0xbb   : > { %v3370_v3 = vrot.slane %v711_v48, %v2800_v20  ;;  %v887_v36 = vrot.slane %v879_v13, %v2962_v57  ;;  %v696_v52 = vcombine.high %v3330_v60, %v628_v46  ;;  %v912_v44 = vcombine.high %v3354_v37, %v3348_v10 }
  0xbc   : > { %v3373_v40 = vrot.slane %v695_v43, %v2800_v20  ;;  %1709 = vrot.lane.b32.xlu1 %v1557_v39, %s2645_s14  ;;  %v1398_v21 = vpop.permute.xlu1 %1397  ;;  %v1539_v51 = vcombine.low %v3390_v26, %v3387_v7  ;;  %v1558_v43 = vcombine.high %v1506_v12, %v1538_v41  ;;  %v664_v39 = vcombine.high %v3303_v50, %v3312_v62 }
  0xbd   : > { %v1396_v53 = vpop.permute.xlu0 %1395  ;;  %v931_v62 = vcombine.low %v887_v36, %v3409_v6  ;;  %v3432_v60 = vrot.slane %v680_v15, %v2800_v20  ;;  %v728_v46 = vcombine.high %v3340_v32, %v3337_v2  ;;  %v726_v10 = vrot.slane %v712_v1, %v2800_v20 }
  0xbe   : > { %v759_v22 = vcombine.low %v3373_v40, %v3370_v3  ;;  %v1547_v42 = vrot.slane %v1539_v51, %v2962_v57  ;;  %v678_v17 = vrot.slane %v664_v39, %v2800_v20  ;;  %v710_v37 = vrot.slane %v696_v52, %v2800_v20 }
  0xbf   : > { %v3449_v39 = vrot.slane %v728_v46, %v2962_v57 }
  0xc0   : > { %v3403_v28 = vrot.slane %v759_v22, %v2962_v57  ;;  %955 = vrot.lane.b32.xlu1 %v930_v49, %s2647_s16  ;;  %v1402_v34 = vpop.permute.xlu1 %1401  ;;  %v760_v49 = vcombine.high %v3373_v40, %v3370_v3  ;;  %v743_v1 = vcombine.low %v678_v17, %v3432_v60  ;;  %v776_v31 = vcombine.high %v710_v37, %v726_v10 }
  0xc1   : > { %v1400_v29 = vpop.permute.xlu0 %1399  ;;  %v1579_v56 = vcombine.low %v1398_v21, %v1402_v34  ;;  %v1580_v47 = vcombine.high %v1398_v21, %v1402_v34 }
  0xc2   : > { %v791_v33 = vcombine.low %v3382_v59, %v3403_v28  ;;  %v1563_v35 = vcombine.low %v1396_v53, %v1400_v29  ;;  %v1564_v48 = vcombine.high %v1396_v53, %v1400_v29  ;;  %v1515_v53 = vrot.slane %v1507_v38, %v2962_v57 }
  0xc3   : > { %v1587_v22 = vrot.slane %v1579_v56, %v2800_v20  ;;  %v1594_v50 = vrot.slane %v1580_v47, %v2800_v20  ;;  %v3453_v52 = vrot.slane %v760_v49, %v2962_v57  ;;  %v3484_v30 = vrot.slane %v743_v1, %v2962_v57 }
  0xc4   : > { %v1571_v21 = vrot.slane %v1563_v35, %v2800_v20  ;;  %1717 = vrot.lane.b32.xlu1 %v1558_v43, %s2647_s16  ;;  %v1406_v41 = vpop.permute.xlu1 %1405  ;;  %v1578_v19 = vrot.slane %v1564_v48, %v2800_v20  ;;  %v1559_v32 = vcombine.low %v1515_v53, %v1547_v42  ;;  %v932_v43 = vcombine.high %v887_v36, %v3409_v6 }
  0xc5   : > { %v1404_v12 = vpop.permute.xlu0 %1403 }
  0xc6   : > { %v1628_v13 = vcombine.high %v1571_v21, %v1587_v22  ;;  %v1627_v48 = vcombine.low %v1571_v21, %v1587_v22  ;;  %v1643_v2 = vcombine.low %v1578_v19, %v1594_v50  ;;  %v775_v22 = vcombine.low %v710_v37, %v726_v10 }
  0xc8   : > { %963 = vrot.lane.b32.xlu1 %v931_v62, %s2646_s15  ;;  %v1410_v34 = vpop.permute.xlu1 %1409  ;;  %v3457_v36 = vrot.slane %v1628_v13, %v2962_v57  ;;  %v1644_v62 = vcombine.high %v1578_v19, %v1594_v50  ;;  %v3463_v46 = vrot.slane %v1643_v2, %v2962_v57  ;;  %v880_v50 = vcombine.high %v3377_v54, %v3361_v45 }
  0xc9   : > { %v1408_v29 = vpop.permute.xlu0 %1407  ;;  %v1611_v56 = vcombine.low %v1406_v41, %v1410_v34  ;;  %v1612_v35 = vcombine.high %v1406_v41, %v1410_v34  ;;  %v744_v19 = vcombine.high %v678_v17, %v3432_v60  ;;  %v1540_v54 = vcombine.high %v3390_v26, %v3387_v7 }
  0xca   : > { %v1595_v51 = vcombine.low %v1404_v12, %v1408_v29  ;;  %v1596_v47 = vcombine.high %v1404_v12, %v1408_v29  ;;  %v1560_v60 = vcombine.high %v1515_v53, %v1547_v42  ;;  %v926_v17 = vrot.slane %v912_v44, %v2962_v57 }
  0xcb   : > { %v1619_v38 = vrot.slane %v1611_v56, %v2800_v20  ;;  %v1626_v15 = vrot.slane %v1612_v35, %v2800_v20  ;;  %v3488_v35 = vrot.slane %v775_v22, %v2962_v57  ;;  %v1658_v10 = vrot.slane %v1644_v62, %v2962_v57 }
  0xcc   : > { %v1603_v3 = vrot.slane %v1595_v51, %v2800_v20  ;;  %v1610_v40 = vrot.slane %v1596_v47, %v2800_v20  ;;  %1725 = vrot.lane.b32.xlu1 %v1559_v32, %s2646_s15  ;;  %v3460_v20 = vrot.slane %v1627_v48, %v2962_v57  ;;  %v793_v47 = vcombine.low %v3449_v39, %v3453_v52 }
  0xcd   : > { %v527_v6 = vpop.permute.xlu0 %526  ;;  %v1508_v32 = vcombine.high %v3400_v55, %v3397_v23  ;;  %v758_v7 = vrot.slane %v744_v19, %v2962_v57  ;;  %v790_v26 = vrot.slane %v776_v31, %v2962_v57  ;;  %v795_v44 = vcombine.low %v3484_v30, %v3488_v35 }
  0xce   : > { %v1659_v21 = vcombine.low %v1603_v3, %v1619_v38  ;;  %v1660_v41 = vcombine.high %v1603_v3, %v1619_v38  ;;  %v1675_v12 = vcombine.low %v1610_v40, %v1626_v15  ;;  %v3469_v49 = vsel %vm578_vm0, %v514_v25, %v527_v6 }
  0xcf   : > { %v1676_v29 = vcombine.high %v1610_v40, %v1626_v15  ;;  %v1554_v53 = vrot.slane %v1540_v54, %v2962_v57  ;;  %v1522_v55 = vrot.slane %v1508_v32, %v2962_v57  ;;  %v797_v40 = vcombine.low %v758_v7, %v790_v26 }
  0xd0   : > { %v3472_v34 = vrot.slane %v1659_v21, %v2962_v57  ;;  %v3475_v13 = vrot.slane %v1660_v41, %v2962_v57  ;;  %v3478_v56 = vrot.slane %v1675_v12, %v2962_v57  ;;  %971 = vrot.lane.b32.xlu1 %v932_v43, %s2648_s17  ;;  %v894_v43 = vrot.slane %v880_v50, %v2962_v57 }
  0xd1   : > { %v1296_v25 = vpop.permute.xlu0 %1295  ;;  %v1690_v37 = vrot.slane %v1676_v29, %v2962_v57  ;;  %v1561_v1 = vcombine.low %v1522_v55, %v1554_v53  ;;  %v2649_v62 = vmov 0.0   ;;  %v1562_v57 = vcombine.high %v1522_v55, %v1554_v53 }
  0xd2   : > { %v1691_v51 = vcombine.low %v3460_v20, %v3472_v34  ;;  %v1693_v45 = vcombine.low %v3457_v36, %v3475_v13  ;;  %v1695_v2 = vcombine.low %v3463_v46, %v3478_v56  ;;  %v933_v42 = vcombine.low %v894_v43, %v926_v17  ;;  %2401 = vmatprep.subr.mxu1 %v2649_v62 }
  0xd3   : > { %v1697_v23 = vcombine.low %v1658_v10, %v1690_v37  ;;  %v934_v21 = vcombine.high %v894_v43, %v926_v17  ;;  %v1698_v41 = vcombine.high %v1658_v10, %v1690_v37  ;;  %v1692_v29 = vcombine.high %v3460_v20, %v3472_v34  ;;  %2406 = vmatprep.subr.mxu0 %v2649_v62  ;;  %v1781_v20 = vld [vmem:[%s3732_s2] sm:$0xff] }
  0xd4   : > { %v2550_v48 = vpack.i.bf16 %v1693_v45, %v793_v47  ;;  %1733 = vrot.lane.b32.xlu1 %v1560_v60, %s2648_s17  ;;  %v2560_v15 = vpack.i.bf16 %v1695_v2, %v795_v44  ;;  %2403 = vmatprep.mubr.msk.f32.mxu1 %vm2650_vm1, %v2649_v62  ;;  %v792_v50 = vcombine.high %v3382_v59, %v3403_v28 }
  0xd5   : > { %v3507_v38 = vpop.permute.xlu0 %534  ;;  %v2570_v22 = vpack.i.bf16 %v1697_v23, %v797_v40  ;;  %2408 = vmatprep.mubr.msk.f32.mxu0 %vm2650_vm1, %v2649_v62  ;;  %v1349_v31 = vsel %vm578_vm0, %v1149_v8, %v1296_v25  ;;  %v1694_v45 = vcombine.high %v3457_v36, %v3475_v13  ;;  %v794_v60 = vcombine.high %v3449_v39, %v3453_v52 }
  0xd6   : > { %2551 = vrot.lane.b32.xlu0 %v2550_v48, %s2645_s14  ;;  %v2545_v47 = vpack.i.bf16 %v1692_v29, %v792_v50  ;;  %v1696_v9 = vcombine.high %v3463_v46, %v3478_v56  ;;  %v796_v8 = vcombine.high %v3484_v30, %v3488_v35  ;;  %v1336_v46 = vpop.permute.xlu1 %1335  ;;  %v798_v56 = vcombine.high %v758_v7, %v790_v26 }
  0xd7   : > { %v2555_v10 = vpack.i.bf16 %v1694_v45, %v794_v60 }
  0xd8   : > { %979 = vrot.lane.b32.xlu1 %v933_v42, %s2643_s12  ;;  %v2565_v13 = vpack.i.bf16 %v1696_v9, %v796_v8 }
  0xd9   : > { %v1304_v3 = vpop.permute.xlu0 %1303 }
  0xda   : > { %2561 = vrot.lane.b32.xlu0 %v2560_v15, %s2646_s15  ;;  %v1351_v54 = vsel %vm581_vm2, %v1349_v31, %v1304_v3  ;;  %v575_v32 = vpop.permute.xlu1 %574  ;;  %v583_v15 = vsel %vm581_vm2, %v3469_v49, %v3507_v38  ;;  %v3738_v3 = vcombine.low %v2965_v58, %v2968_v61  ;;  %s216_s15 = sand.u32 1, %s2629_s19  }
  0xdb   : > { %s2258_s8 = scalar_lea.sflag [#allocation3], %s216_s15 }
  0xdc   : > { %1741 = vrot.lane.b32.xlu1 %v1561_v1, %s2643_s12 }
  0xdd   : > { %v543_v6 = vpop.permute.xlu0 %542 }
  0xde   : > { %2571 = vrot.lane.b32.xlu0 %v2570_v22, %s2643_s12  ;;  %v2517_v53 = vpop.permute.xlu1 %2516  ;;  %v586_v1 = vsel %vm584_vm3, %v583_v15, %v543_v6 }
  0xdf   : > { %v2519_v55 = vunpack.i.h.bf16 %v2517_v53  ;;  %v2518_v7 = vunpack.i.l.bf16 %v2517_v53 }
  0xe0   : > { %987 = vrot.lane.b32.xlu1 %v934_v21, %s2644_s13 }
  0xe1   : > { %v1312_v12 = vpop.permute.xlu0 %1311 }
  0xe2   : > { %1751 = vrot.lane.b32.xlu0 %v1698_v41, %s2644_s13  ;;  %v1353_v16 = vsel %vm584_vm3, %v1351_v54, %v1312_v12  ;;  %v2527_v41 = vpop.permute.xlu1 %2526 }
  0xe3   : > { %v2529_v63 = vunpack.i.h.bf16 %v2527_v41  ;;  %v2528_v4 = vunpack.i.l.bf16 %v2527_v41 }
  0xe4   : > { %1749 = vrot.lane.b32.xlu1 %v1562_v57, %s2644_s13 }
  0xe5   : > { %v551_v19 = vpop.permute.xlu0 %550 }
  0xe6   : > { %v589_v57 = vsel %vm587_vm4, %v586_v1, %v551_v19 }
  0xe8   : > { %2546 = vrot.lane.b32.xlu1 %v2545_v47, %s2642_s11  ;;  %s2579_s11 = sshll.u32 %s2652_s10, 4  ;;  %s2580_s11 = int_to_ptr.vmem [resolvable:$false] %s2579_s11 }
  0xe9   : > { %v1320_v17 = vpop.permute.xlu0 %1319  ;;  %s2581_s12 = scalar_lea.vmem %s2580_s11, 256 }
  0xea   : > { %v1355_v25 = vsel %vm587_vm4, %v1353_v16, %v1320_v17 }
  0xec   : > { %2556 = vrot.lane.b32.xlu1 %v2555_v10, %s2647_s16  ;;  %s2365_s16 = sshll.u32 %s216_s15, 3 }
  0xed   : > { %v559_v36 = vpop.permute.xlu0 %558 }
  0xee   : > { %v592_v6 = vsel %vm590_vm5, %v589_v57, %v559_v36 }
  0xf0   : > { %2566 = vrot.lane.b32.xlu1 %v2565_v13, %s2648_s17  ;;  %s218_s17 = scalar_lea.vmem [#allocation2], %s2365_s16 }
  0xf1   : > { %v1328_v39 = vpop.permute.xlu0 %1327  ;;  %s2275_s25 = sshll.u32 %s218_s17, 4  ;;  %s2276_s25 = int_to_ptr.vmem [resolvable:$true] %s2275_s25 }
  0xf2   : > { %v1357_v52 = vsel %vm590_vm5, %v1355_v25, %v1328_v39  ;;  %s2575_s9 = scalar_lea.vmem %s2276_s25, 128  ;;  %p2582_p0 = scmp.lt.s32.totalorder %s2276_s25, %s2580_s11 }
  0xf3   : > { %v1359_v37 = vsel %vm593_vm6, %v1357_v52, %v1336_v46  ;;  %p2576_p11 = scmp.ne.s32.totalorder %s2276_s25, %s2575_s9  ;;  %p2583_p1 = scmp.lt.s32.totalorder %s2581_s12, %s2575_s9 }
  0xf4   : > { %985 = vrot.lane.b32.xlu1 %v798_v56, %s2644_s13 }
  0xf5   : > { %v567_v48 = vpop.permute.xlu0 %566  ;;  %p2577_p12 = pnand %p2576_p11, %p2721_p5  ;;  %p2584_p2 = por %p2583_p1, %p2582_p0 }
  0xf6   : > { %v595_v19 = vsel %vm593_vm6, %v592_v6, %v567_v48 }
  0xf7   : > { %v3583_v39 = vsel %vm596_vm7, %v595_v19, %v575_v32  ;;  %p2578_p13 = pneg %p2577_p12 }
  0xf9   : > { %v2512_v2 = vpop.permute.xlu0 %2511  ;;  %p2585_p3 = pnand %p2584_p2, %p2578_p13 }
  0xfa   : > { %v2514_v44 = vunpack.i.h.bf16 %v2512_v2  ;;  %v2513_v42 = vunpack.i.l.bf16 %v2512_v2 }
  0xfc   : > { %v1350_v26 = vsel %vm578_vm0, %v1285_v14, %v2514_v44  ;;  %v579_v40 = vsel %vm578_vm0, %v3738_v3, %v2513_v42 }
  0xfd   : > { %v1344_v30 = vpop.permute.xlu0 %1343  ;;  %v582_v49 = vsel %vm581_vm2, %v579_v40, %v2518_v7  ;;  %v1352_v38 = vsel %vm581_vm2, %v1350_v26, %v2519_v55 }
  0xfe   : > { %v3580_v25 = vsel %vm596_vm7, %v1359_v37, %v1344_v30 }
 0x101   : > { %v2522_v35 = vpop.permute.xlu0 %2521 }
 0x102   : > { %v2524_v22 = vunpack.i.h.bf16 %v2522_v35  ;;  %v2523_v21 = vunpack.i.l.bf16 %v2522_v35 }
 0x104   : > { %v585_v14 = vsel %vm584_vm3, %v582_v49, %v2523_v21  ;;  %v1354_v58 = vsel %vm584_vm3, %v1352_v38, %v2524_v22 }
 0x105   : > { %v588_v47 = vsel %vm587_vm4, %v585_v14, %v2528_v4  ;;  %v1356_v45 = vsel %vm587_vm4, %v1354_v58, %v2529_v63 }
 0x116   : > { %v940_v43 = vpop.permute.xlu0 %939 }
 0x117   : > { %v992_v15 = vsel %vm578_vm0, %v927_v11, %v940_v43 }
 0x11a   : > { %v948_v23 = vpop.permute.xlu0 %947 }
 0x11b   : > { %v994_v55 = vsel %vm581_vm2, %v992_v15, %v948_v23 }
 0x11e   : > { %v2532_v12 = vpop.permute.xlu0 %2531 }
 0x11f   : > { %v2534_v50 = vunpack.i.h.bf16 %v2532_v12  ;;  %v2533_v31 = vunpack.i.l.bf16 %v2532_v12 }
 0x121   : > { %v591_v16 = vsel %vm590_vm5, %v588_v47, %v2533_v31  ;;  %v1358_v8 = vsel %vm590_vm5, %v1356_v45, %v2534_v50 }
 0x122   : > { %v2542_v29 = vpop.permute.xlu0 %2541 }
 0x123   : > { %v2544_v60 = vunpack.i.h.bf16 %v2542_v29  ;;  %v2543_v17 = vunpack.i.l.bf16 %v2542_v29 }
 0x126   : > { %v1702_v61 = vpop.permute.xlu1 %1701 }
 0x127   : > { %v1755_v40 = vsel %vm578_vm0, %v1555_v18, %v1702_v61 }
 0x12a   : > { %v2537_v54 = vpop.permute.xlu1 %2536 }
 0x12b   : > { %v2539_v10 = vunpack.i.h.bf16 %v2537_v54  ;;  %v2538_v9 = vunpack.i.l.bf16 %v2537_v54 }
 0x12d   : > { %v594_v36 = vsel %vm593_vm6, %v591_v16, %v2538_v9  ;;  %v1360_v13 = vsel %vm593_vm6, %v1358_v8, %v2539_v10  ;;  %v1782_v10 = vld [vmem:[%s3733_s3] sm:$0xff] }
 0x12e   : > { %v3586_v52 = vsel %vm596_vm7, %v594_v36, %v2543_v17  ;;  %v3589_v46 = vsel %vm596_vm7, %v1360_v13, %v2544_v60  ;;  %v1710_v56 = vpop.permute.xlu1 %1709  ;;  %v2651_v13 = vmov 0.0|0.0  }
 0x12f   : > { %v2440_v48 = vpack.c.bf16 %v3583_v39, %v3586_v52  ;;  %v2446_v2 = vpack.c.bf16 %v3589_v46, %v3580_v25  ;;  %v1757_v22 = vsel %vm581_vm2, %v1755_v40, %v1710_v56  ;;  %v2374_v40 = vld [vmem:[%s3731_s1 + $0x8] sm:$0xff] }
 0x132   : > { %v956_v35 = vpop.permute.xlu1 %955 }
 0x133   : > { %v996_v26 = vsel %vm584_vm3, %v994_v55, %v956_v35 }
 0x136   : > { %v1718_v44 = vpop.permute.xlu1 %1717 }
 0x137   : > { %v1759_v11 = vsel %vm584_vm3, %v1757_v22, %v1718_v44 }
 0x13a   : > { %v964_v37 = vpop.permute.xlu1 %963 }
 0x13b   : > { %v998_v3 = vsel %vm587_vm4, %v996_v26, %v964_v37  ;;  %v1939_v37 = vld [vmem:[%s3731_s1] sm:$0xff] }
 0x13e   : > { %v1726_v30 = vpop.permute.xlu1 %1725 }
 0x13f   : > { %v1761_v23 = vsel %vm587_vm4, %v1759_v11, %v1726_v30  ;;  %v2376_v30 = vld [vmem:[%s3731_s1 + $0x10] sm:$0xff] }
 0x142   : > { %v972_v42 = vpop.permute.xlu1 %971 }
 0x143   : > { %v1000_v1 = vsel %vm590_vm5, %v998_v3, %v972_v42 }
 0x146   : > { %v1734_v32 = vpop.permute.xlu1 %1733 }
 0x147   : > { %v1763_v24 = vsel %vm590_vm5, %v1761_v23, %v1734_v32 }
 0x148   : > { %v2552_v21 = vpop.permute.xlu0 %2551 }
 0x149   : > { %v2554_v45 = vunpack.i.h.bf16 %v2552_v21  ;;  %v2553_v54 = vunpack.i.l.bf16 %v2552_v21 }
 0x14a   : > { %v980_v53 = vpop.permute.xlu1 %979 }
 0x14b   : > { %v1002_v0 = vsel %vm593_vm6, %v1000_v1, %v980_v53  ;;  %v2378_v1 = vld [vmem:[%s3731_s1 + $0x18] sm:$0xff] }
 0x14c   : > { %v2562_v63 = vpop.permute.xlu0 %2561 }
 0x14d   : > { %v2564_v8 = vunpack.i.h.bf16 %v2562_v63  ;;  %v2563_v36 = vunpack.i.l.bf16 %v2562_v63 }
 0x14e   : > { %v1742_v7 = vpop.permute.xlu1 %1741 }
 0x14f   : > { %v1765_v5 = vsel %vm593_vm6, %v1763_v24, %v1742_v7 }
 0x150   : > { %v2572_v59 = vpop.permute.xlu0 %2571 }
 0x151   : > { %v2574_v42 = vunpack.i.h.bf16 %v2572_v59  ;;  %v2573_v32 = vunpack.i.l.bf16 %v2572_v59 }
 0x152   : > { %v988_v27 = vpop.permute.xlu1 %987 }
 0x153   : > { %v3611_v43 = vsel %vm596_vm7, %v1002_v0, %v988_v27 }
 0x154   : > { %v1770_v41 = vrot.slane %v3611_v43, 4  ;;  %v1752_v46 = vpop.permute.xlu0 %1751 }
 0x156   : > { %v1772_v18 = vmax.f32 %v3583_v39, %v1770_v41  ;;  %v1778_v49 = vmin.f32 %v3583_v39, %v1770_v41  ;;  %v1750_v38 = vpop.permute.xlu1 %1749 }
 0x157   : > { %v3620_v12 = vsel %vm596_vm7, %v1765_v5, %v1750_v38 }
 0x158   : > { %v1774_v57 = vrot.slane %v3620_v12, 4 }
 0x15a   : > { %v1776_v4 = vmax.f32 %v3580_v25, %v1774_v57  ;;  %v1779_v14 = vmin.f32 %v3580_v25, %v1774_v57  ;;  %v2547_v58 = vpop.permute.xlu1 %2546 }
 0x15b   : > { %v2549_v61 = vunpack.i.h.bf16 %v2547_v58  ;;  %v2548_v29 = vunpack.i.l.bf16 %v2547_v58 }
 0x15c   : > { %v1780_v6 = vmin.f32 %v1778_v49, %v1779_v14  ;;  %v1777_v50 = vmax.f32 %v1772_v18, %v1776_v4 }
 0x15d   : > { %v1756_v31 = vsel %vm578_vm0, %v1691_v51, %v2549_v61  ;;  %v991_v47 = vsel %vm578_vm0, %v791_v33, %v2548_v29 }
 0x15e   : > { %v2557_v60 = vpop.permute.xlu1 %2556  ;;  %v1784_v17 = vrot.slane %v1780_v6, 4  ;;  %v1863_v19 = vrot.slane %v1777_v50, 4  ;;  %v993_v28 = vsel %vm581_vm2, %v991_v47, %v2553_v54  ;;  %v1758_v33 = vsel %vm581_vm2, %v1756_v31, %v2554_v45 }
 0x15f   : > { %v2559_v34 = vunpack.i.h.bf16 %v2557_v60  ;;  %v2558_v51 = vunpack.i.l.bf16 %v2557_v60 }
 0x160   : > { %2402 = vmatpush3.msk.msra.mxu1 %vm1789_vm8, %v1784_v17  ;;  %2407 = vmatpush3.msk.msra.mxu0 %vm1789_vm8, %v1863_v19 }
 0x161   : > { %v995_v9 = vsel %vm584_vm3, %v993_v28, %v2558_v51  ;;  %v1760_v16 = vsel %vm584_vm3, %v1758_v33, %v2559_v34  ;;  %2404 = vmatmul.mubr.msk.f32.vlgmr.msra.gmra.mrb[0].mxu1 %vm1785_vm9, %v1782_v10  ;;  %2409 = vmatmul.mubr.msk.f32.vlgmr.msra.gmra.mrb[0].mxu0 %vm1785_vm9, %v1781_v20 }
 0x162   : > { %2439 = vmatprep.subr.bf16.mxu1 %v2651_v13  ;;  %2445 = vmatprep.subr.bf16.mxu0 %v2651_v13  ;;  %v2567_v56 = vpop.permute.xlu1 %2566  ;;  %v1762_v53 = vsel %vm587_vm4, %v1760_v16, %v2564_v8  ;;  %v997_v25 = vsel %vm587_vm4, %v995_v9, %v2563_v36 }
 0x163   : > { %v2569_v35 = vunpack.i.h.bf16 %v2567_v56  ;;  %v2568_v44 = vunpack.i.l.bf16 %v2567_v56  ;;  %2441 = vmatpush3.bf16.msra.mxu1 %v2440_v48  ;;  %2447 = vmatpush3.bf16.msra.mxu0 %v2446_v2 }
 0x164   : > { %2415 = vmatprep.mubr.msk.f32.mxu1 %vm2650_vm1, %v2649_v62  ;;  %2429 = vmatprep.mubr.msk.f32.mxu0 %vm2650_vm1, %v2649_v62 }
 0x165   : > { %v1764_v39 = vsel %vm590_vm5, %v1762_v53, %v2569_v35  ;;  %v999_v52 = vsel %vm590_vm5, %v997_v25, %v2568_v44  ;;  %2442 = vmatprep.subr.bf16.mxu1 %v2651_v13  ;;  %2448 = vmatprep.subr.bf16.mxu0 %v2651_v13 }
 0x166   : > { %v1766_v48 = vsel %vm593_vm6, %v1764_v39, %v2574_v42  ;;  %2416 = vmatmul.mubr.msk.f32.vlgmr.msra.gmra.mrb[2].mxu1 %vm581_vm2, %v1939_v37  ;;  %2430 = vmatmul.mubr.msk.f32.vlgmr.msra.gmra.mrb[2].mxu0 %vm581_vm2, %v2376_v30  ;;  %v986_v2 = vpop.permute.xlu1 %985  ;;  %v1001_v15 = vsel %vm593_vm6, %v999_v52, %v2573_v32 }
 0x167   : > { %v1003_v55 = vsel %vm596_vm7, %v1001_v15, %v986_v2  ;;  %v1768_v7 = vsel %vm596_vm7, %v1766_v48, %v1752_v46  ;;  %2422 = vmatprep.mubr.msk.f32.mxu1 %vm2650_vm1, %v2649_v62  ;;  %2436 = vmatprep.mubr.msk.f32.mxu0 %vm2650_vm1, %v2649_v62 }
 0x168   : > { %v2443_v26 = vpack.c.bf16 %v3611_v43, %v1003_v55  ;;  %v2449_v3 = vpack.c.bf16 %v1768_v7, %v3620_v12 }
 0x16a   : > { %2444 = vmatpush3.bf16.msra.mxu1 %v2443_v26  ;;  %2450 = vmatpush3.bf16.msra.mxu0 %v2449_v3 }
 0x16e   : > { %2423 = vmatmul.mubr.msk.f32.vlgmr.msra.gmra.mrb[2].mxu1 %vm581_vm2, %v2374_v40  ;;  %2437 = vmatmul.mubr.msk.f32.vlgmr.msra.gmra.mrb[2].mxu0 %vm581_vm2, %v2378_v1 }
 0x234   : > { %v1858_v22 = vpop.f32.mrb[0].mxu1  ;;  %v1935_v62 = vpop.f32.mrb[0].mxu0 }
 0x235   : > { %v2405_v0 = vpop.f32.mrb[1].mxu1  ;;  %v1936_v27 = vadd.f32 %v1935_v62, %v1858_v22  ;;  %v2410_v11 = vpop.f32.mrb[1].mxu0 }
 0x241   : > { %v2085_v43 = vpop.f32.mrb[2].mxu1  ;;  %v2237_v23 = vpop.f32.mrb[2].mxu0 }
 0x242   : > { %v2452_v21 = vadd.f32 %v2085_v43, %v1936_v27  ;;  %v2424_v41 = vpop.f32.mrb[3].mxu1  ;;  %v2438_v24 = vpop.f32.mrb[3].mxu0 }
 0x244   : > { %v2453_v5 = vadd.f32 %v2452_v21, %v2237_v23 }
 0x246   : > { %v2244_v18 = vsel %vm2242_vm10, %v2453_v5, 0.0  ;;  %v2248_v49 = vmul.f32 %v2453_v5, %v2453_v5  ;;  %2243 = vst.msk [vmem:[%s218_s17] sm:$0xff] %vm2242_vm10, %v2453_v5 }
 0x247   : > { %2245 = vadd.xlane.f32.xlu1 %v2244_v18 }
 0x248   : > { %v2249_v38 = vsel %vm2242_vm10, %v2248_v49, 0.0 }
 0x249   : > { %2250 = vadd.xlane.f32.xlu0 %v2249_v38 }
 0x24a   : > { %2588 = shalt.err (!%p2585_p3)
}
 0x24b   : > { %s2589_s22 = scalar_lea.hbm %s3690_s7, 128  ;;  %s2593_s15 = scalar_lea.hbm %s3734_s4, 256 }
 0x24c   : > { %p2590_p4 = scmp.ne.s32.totalorder %s3690_s7, %s2589_s22  ;;  %p2594_p9 = scmp.lt.u32.totalorder %s3690_s7, %s3734_s4 }
 0x24d   : > { %p2595_p10 = scmp.lt.u32.totalorder %s2593_s15, %s2589_s22  ;;  %p2597_p12 = scmp.lt.u32.totalorder %s2589_s22, %s3690_s7 }
 0x24e   : > { %p2591_p7 = pnand %p2590_p4, %p2721_p5 }
 0x24f   : > { %p2596_p11 = por %p2595_p10, %p2594_p9 }
 0x250   : > { %p2592_p8 = pneg %p2591_p7 }
 0x251   : > { %p2598_p13 = por %p2597_p12, %p2596_p11 }
 0x253   : > { %p2599_p0 = pnand %p2598_p13, %p2592_p8 }
 0x255   : > { %2602 = shalt.err (!%p2599_p0)
}
 0x256   : > { %2458 = dma.vmem_to_hbm [thread:$0]  (%p2721_p5), %s2276_s25, 128, %s3690_s7, %s2258_s8   ;;  %vm2253_vm11 = vcmask 7168   ;;  %vm2255_vm12 = vcmask 15368  }
 0x257   : > { %s2368_s23 = sshll.u32 %s2733_s30, 3 }
 0x258   : > { %s233_s9 = scalar_lea.vmem %s3735_s5, %s2368_s23 }
 0x2d4   : > { %v2246_v12 = vpop.xlane.xlu1 %2245 }
 0x2d5   : > { %2254 = vst.msk [vmem:[%s233_s9] sm:$0xff] %vm2253_vm11, %v2246_v12 }
 0x2d6   : > { %v2251_v57 = vpop.xlane.xlu0 %2250 }
 0x2d7   : > { %2256 = vst.msk [vmem:[%s233_s9] sm:$0xff] %vm2255_vm12, %v2251_v57 }
 0x2d8 PF: > { %p2464_p1 = scmp.ge.s32.totalorder %s2637_s21, 2  ;;  %s2290_s28 = sand.u32 1, %s2625_s18  }
 0x2d9   : > { %s2291_s25 = scalar_lea.sflag [#allocation3], %s2290_s28 }
 0x2da   : > { %p2461_p2 = pnand %p2464_p1, %p2725_p6 }
 0x2dc   : > { %2620 = dma.done.wait (!%p2461_p2), %s2291_s25, 128  }
 0x2dd   : > { %2622 = vsyncadd (!%p2461_p2), %s2291_s25, 4294967168  ;;  %p16_p5 = scmp.ge.s32.totalorder %s2708_s24, 4   ;;  %s3739_s18 = smov %s2629_s19 }
 0x2de   : > { %s3740_s19 = smov %s2633_s20  ;;  %s3741_s20 = smov %s2719_s27 }
 0x2df   : > { %s3742_s21 = smov %s2708_s24  ;;  %18 = sbr.rel (!%p16_p5) target bundleno = 3 (0x3), region = 86 }
 0x2e6   :  { %2303 = vsyncpa [#allocation3], 1 }
 0x2e7   :  { %2305 = vsyncpa [#allocation3 + $0x1], 1 }

</bundles_post_ra>
